<compile_context>
chip_gen: v7x
topology: tpu7x:2x2x1
jax: 0.10.0
libtpu: 0.0.40
codegen_flags: <defaults>
</compile_context>

<pallas_src>
import functools

import jax
import jax.numpy as jnp
from jax.experimental import pallas as pl
from jax.experimental.pallas import tpu as pltpu

BN_EPS = 1e-5
_VMEM = pltpu.MemorySpace.VMEM
_VMEM_LIMIT = 32 * 1024 * 1024  # safe scoped-VMEM limit on v5e / v6e / v7x


# ---------------------------------------------------------------------------
# Fused single-block kernel (small batches: everything resident in VMEM).
# ---------------------------------------------------------------------------
def _fused_kernel(x_ref, w1_ref, gamma_ref, beta_ref, w2_ref, b2_ref, o_ref):
    # layer1 on the MXU: bf16 operands, f32 accumulation.  b1 omitted — it is
    # cancelled by the BN mean subtraction below.
    x = x_ref[...].astype(jnp.bfloat16)
    h = jnp.dot(x, w1_ref[...].astype(jnp.bfloat16),
                preferred_element_type=jnp.float32)            # (B, H) f32

    # BatchNorm1d, training mode (biased batch statistics); gamma folded into
    # the rsqrt so the (B, H) epilogue is one FMA.  rsqrt runs on the EUP.
    mean = jnp.mean(h, axis=0, keepdims=True)
    centered = h - mean
    var = jnp.mean(centered * centered, axis=0, keepdims=True)
    scale = gamma_ref[...] * jax.lax.rsqrt(var + BN_EPS)       # (1, H)
    a = jnp.maximum(centered * scale + beta_ref[...], 0.0)     # BN + ReLU

    # layer2 on the MXU.
    o_ref[...] = (jnp.dot(a.astype(jnp.bfloat16),
                          w2_ref[...].astype(jnp.bfloat16),
                          preferred_element_type=jnp.float32)
                  + b2_ref[...])


def _forward_fused(x, params):
    B = x.shape[0]
    w1, gamma, beta, w2, b2 = (params["w1"], params["gamma"], params["beta"],
                               params["w2"], params["b2"])
    num_classes = w2.shape[1]

    def full(shape):
        return pl.BlockSpec(shape, lambda: (0,) * len(shape), memory_space=_VMEM)

    return pl.pallas_call(
        _fused_kernel,
        out_shape=jax.ShapeDtypeStruct((B, num_classes), jnp.float32),
        in_specs=[full(x.shape), full(w1.shape), full(gamma.shape),
                  full(beta.shape), full(w2.shape), full(b2.shape)],
        out_specs=full((B, num_classes)),
        compiler_params=pltpu.CompilerParams(vmem_limit_bytes=_VMEM_LIMIT),
    )(x, w1, gamma, beta, w2, b2)


# ---------------------------------------------------------------------------
# Batch-tiled two-phase path (large batches).
# ---------------------------------------------------------------------------
def _stage1_kernel(x_ref, w1_ref, h_ref, sum_ref, sq_ref):
    # Per-feature sum / sum-of-squares accumulate in resident output blocks.
    @pl.when(pl.program_id(0) == 0)
    def _():
        sum_ref[...] = jnp.zeros_like(sum_ref)
        sq_ref[...] = jnp.zeros_like(sq_ref)

    x = x_ref[...].astype(jnp.bfloat16)
    h = jnp.dot(x, w1_ref[...].astype(jnp.bfloat16),
                preferred_element_type=jnp.float32)            # (TB, H) f32
    h_ref[...] = h
    sum_ref[...] += jnp.sum(h, axis=0, keepdims=True)
    sq_ref[...] += jnp.sum(h * h, axis=0, keepdims=True)


def _stage2_kernel(h_ref, sum_ref, sq_ref, gamma_ref, beta_ref, w2_ref, b2_ref,
                   o_ref, *, batch_size):
    inv_b = 1.0 / float(batch_size)
    mean = sum_ref[...] * inv_b                                # (1, H)
    var = jnp.maximum(sq_ref[...] * inv_b - mean * mean, 0.0)  # biased var
    scale = gamma_ref[...] * jax.lax.rsqrt(var + BN_EPS)       # (1, H)
    shift = beta_ref[...] - mean * scale
    a = jnp.maximum(h_ref[...] * scale + shift, 0.0)           # BN + ReLU
    o_ref[...] = (jnp.dot(a.astype(jnp.bfloat16),
                          w2_ref[...].astype(jnp.bfloat16),
                          preferred_element_type=jnp.float32)
                  + b2_ref[...])


def _pick_batch_tile(batch):
    # Largest multiple-of-8 tile <= 256 that divides the batch; f32 (TB, H)
    # double-buffered tiles then stay well inside v7x's 64 MiB VMEM for
    # typical hidden sizes.  Fall back to a single full-batch block.
    for tb in (256, 128, 64, 32, 16, 8):
        if batch % tb == 0:
            return tb
    return batch


def _forward_tiled(x, params, batch_tile=None):
    B, input_size = x.shape
    w1, gamma, beta, w2, b2 = (params["w1"], params["gamma"], params["beta"],
                               params["w2"], params["b2"])
    hidden = w1.shape[1]
    num_classes = w2.shape[1]

    tb = _pick_batch_tile(B) if batch_tile is None else batch_tile
    assert B % tb == 0 and (tb % 8 == 0 or tb == B), (B, tb)
    nb = B // tb

    def rep(shape):   # operand whose block is identical for every batch tile
        return pl.BlockSpec(shape, lambda i: (0,) * len(shape),
                            memory_space=_VMEM)

    # Phase 1: layer1 matmul per batch tile + per-feature sum / sum-of-squares
    # accumulated in resident (1, H) output blocks -> batch axis "arbitrary".
    h, ssum, ssq = pl.pallas_call(
        _stage1_kernel,
        out_shape=(jax.ShapeDtypeStruct((B, hidden), jnp.float32),
                   jax.ShapeDtypeStruct((1, hidden), jnp.float32),
                   jax.ShapeDtypeStruct((1, hidden), jnp.float32)),
        grid=(nb,),
        in_specs=[pl.BlockSpec((tb, input_size), lambda i: (i, 0),
                               memory_space=_VMEM),
                  rep(w1.shape)],
        out_specs=(pl.BlockSpec((tb, hidden), lambda i: (i, 0),
                                memory_space=_VMEM),
                   rep((1, hidden)),
                   rep((1, hidden))),
        compiler_params=pltpu.CompilerParams(
            dimension_semantics=("arbitrary",),
            vmem_limit_bytes=_VMEM_LIMIT),
    )(x, w1)

    # Phase 2: normalize + ReLU + layer2 per batch tile; tiles are independent
    # -> "parallel" so v7x's two TensorCores split the batch.
    return pl.pallas_call(
        functools.partial(_stage2_kernel, batch_size=B),
        out_shape=jax.ShapeDtypeStruct((B, num_classes), jnp.float32),
        grid=(nb,),
        in_specs=[pl.BlockSpec((tb, hidden), lambda i: (i, 0),
                               memory_space=_VMEM),
                  rep((1, hidden)), rep((1, hidden)),
                  rep(gamma.shape), rep(beta.shape),
                  rep(w2.shape), rep(b2.shape)],
        out_specs=pl.BlockSpec((tb, num_classes), lambda i: (i, 0),
                               memory_space=_VMEM),
        compiler_params=pltpu.CompilerParams(
            dimension_semantics=("parallel",),
            vmem_limit_bytes=_VMEM_LIMIT),
    )(h, ssum, ssq, gamma, beta, w2, b2)


# ---------------------------------------------------------------------------
# Public forward + params
# ---------------------------------------------------------------------------
def my_model_forward(input_ids, attention_mask, params, *,
                     fused_batch_limit=512, batch_tile=None):
    """attention_mask is unused (mirrors the PyTorch forward).

    The float cast of input_ids happens inside the kernels (free under DMA).
    Small batches take the fused single-block path; large batches (or an
    explicit batch_tile) take the two-phase batch-tiled path.
    """
    del attention_mask
    B = input_ids.shape[0]
    if batch_tile is None and B <= fused_batch_limit:
        return _forward_fused(input_ids, params)
    return _forward_tiled(input_ids, params, batch_tile=batch_tile)


def init_params(key, input_size, hidden_size, num_classes):
    """PyTorch-like init.  Linear weights stored transposed: (in, out).
    b1 is kept for module parity but never read by the kernels (it is
    mathematically cancelled by the training-mode BatchNorm centering)."""
    k1, k2, k3, k4 = jax.random.split(key, 4)
    bound1 = 1.0 / jnp.sqrt(input_size)
    bound2 = 1.0 / jnp.sqrt(hidden_size)
    return {
        "w1": jax.random.uniform(k1, (input_size, hidden_size), jnp.float32,
                                 -bound1, bound1),
        "b1": jax.random.uniform(k2, (1, hidden_size), jnp.float32,
                                 -bound1, bound1),
        "gamma": jnp.ones((1, hidden_size), jnp.float32),
        "beta": jnp.zeros((1, hidden_size), jnp.float32),
        "w2": jax.random.uniform(k3, (hidden_size, num_classes), jnp.float32,
                                 -bound2, bound2),
        "b2": jax.random.uniform(k4, (1, num_classes), jnp.float32,
                                 -bound2, bound2),
    }


def _reference_forward(x, params):
    """Pure-JAX f32 reference (includes b1, which BN then cancels)."""
    h = x.astype(jnp.float32) @ params["w1"] + params["b1"]
    mean = h.mean(axis=0, keepdims=True)
    var = ((h - mean) ** 2).mean(axis=0, keepdims=True)
    h = (h - mean) * jax.lax.rsqrt(var + BN_EPS) * params["gamma"] + params["beta"]
    return jnp.maximum(h, 0.0) @ params["w2"] + params["b2"]


if __name__ == "__main__":
    input_size, hidden_size, num_classes = 32, 64, 8

    key = jax.random.PRNGKey(0)
    kp, kx_small, kx_big = jax.random.split(key, 3)
    params = init_params(kp, input_size, hidden_size, num_classes)

    # --- small batch: fused single-block path ------------------------------
    batch = 8
    input_ids = jax.random.normal(kx_small, (batch, input_size), jnp.float32)
    attention_mask = jnp.ones((batch, input_size), jnp.float32)  # unused

    out_fused = my_model_forward(input_ids, attention_mask, params)
    jax.block_until_ready(out_fused)
    assert out_fused.shape == (batch, num_classes)
    ref = _reference_forward(input_ids, params)
    assert float(jnp.max(jnp.abs(out_fused - ref))) < 0.3  # bf16-matmul tol

    # --- same inputs through the batch-tiled two-phase path -----------------
    out_tiled_small = my_model_forward(input_ids, attention_mask, params,
                                       batch_tile=8)
    jax.block_until_ready(out_tiled_small)
    assert float(jnp.max(jnp.abs(out_tiled_small - out_fused))) < 1e-2

    # --- multi-tile grid (4 batch tiles) exercising stats accumulation ------
    batch_big = 32
    input_ids_big = jax.random.normal(kx_big, (batch_big, input_size),
                                      jnp.float32)
    mask_big = jnp.ones((batch_big, input_size), jnp.float32)    # unused
    out_tiled = my_model_forward(input_ids_big, mask_big, params, batch_tile=8)
    jax.block_until_ready(out_tiled)
    assert out_tiled.shape == (batch_big, num_classes)
    ref_big = _reference_forward(input_ids_big, params)
    assert float(jnp.max(jnp.abs(out_tiled - ref_big))) < 0.3

    print("KERNEL_OK")
</pallas_src>

<mosaic_0001>
module attributes {stable_mosaic.version = 11 : i64} {
  func.func @_fused_kernel(%arg0: memref<8x32xf32, #tpu.memory_space<vmem>>, %arg1: memref<32x64xf32, #tpu.memory_space<vmem>>, %arg2: memref<1x64xf32, #tpu.memory_space<vmem>>, %arg3: memref<1x64xf32, #tpu.memory_space<vmem>>, %arg4: memref<64x8xf32, #tpu.memory_space<vmem>>, %arg5: memref<1x8xf32, #tpu.memory_space<vmem>>, %arg6: memref<8x8xf32, #tpu.memory_space<vmem>>) attributes {dimension_semantics = [], scalar_prefetch = 0 : i64, scratch_operands = 0 : i64, tpu.core_type = #tpu.core_type<tc>} {
    %c0 = arith.constant 0 : index
    %c0_0 = arith.constant 0 : index
    %0 = vector.load %arg0[%c0, %c0_0] : memref<8x32xf32, #tpu.memory_space<vmem>>, vector<8x32xf32>
    %1 = arith.truncf %0 : vector<8x32xf32> to vector<8x32xbf16>
    %c0_1 = arith.constant 0 : index
    %c0_2 = arith.constant 0 : index
    %2 = vector.load %arg1[%c0_1, %c0_2] : memref<32x64xf32, #tpu.memory_space<vmem>>, vector<32x64xf32>
    %3 = arith.truncf %2 : vector<32x64xf32> to vector<32x64xbf16>
    %cst = arith.constant dense<0.000000e+00> : vector<8x64xf32>
    %4 = tpu.matmul %1, %3, %cst {dimension_numbers = #tpu.dot_dimension_numbers<[1], [0], [0], [1], [0, 0, 1, 1], [], []>} : vector<8x32xbf16>, vector<32x64xbf16>, vector<8x64xf32> -> vector<8x64xf32>
    %cst_3 = arith.constant dense<0.000000e+00> : vector<64xf32>
    %5 = vector.multi_reduction <add>, %4, %cst_3 [0] : vector<8x64xf32> to vector<64xf32>
    %6 = vector.shape_cast %5 : vector<64xf32> to vector<1x64xf32>
    %cst_4 = arith.constant 8.000000e+00 : f32
    %7 = vector.broadcast %cst_4 : f32 to vector<1x64xf32>
    %8 = arith.divf %6, %7 : vector<1x64xf32>
    %9 = vector.broadcast %8 : vector<1x64xf32> to vector<8x64xf32>
    %10 = arith.subf %4, %9 : vector<8x64xf32>
    %11 = arith.mulf %10, %10 : vector<8x64xf32>
    %cst_5 = arith.constant dense<0.000000e+00> : vector<64xf32>
    %12 = vector.multi_reduction <add>, %11, %cst_5 [0] : vector<8x64xf32> to vector<64xf32>
    %13 = vector.shape_cast %12 : vector<64xf32> to vector<1x64xf32>
    %cst_6 = arith.constant 8.000000e+00 : f32
    %14 = vector.broadcast %cst_6 : f32 to vector<1x64xf32>
    %15 = arith.divf %13, %14 : vector<1x64xf32>
    %c0_7 = arith.constant 0 : index
    %c0_8 = arith.constant 0 : index
    %16 = vector.load %arg2[%c0_7, %c0_8] : memref<1x64xf32, #tpu.memory_space<vmem>>, vector<1x64xf32>
    %cst_9 = arith.constant 9.99999974E-6 : f32
    %17 = vector.broadcast %cst_9 : f32 to vector<1x64xf32>
    %18 = arith.addf %15, %17 : vector<1x64xf32>
    %19 = math.rsqrt %18 : vector<1x64xf32>
    %20 = arith.mulf %16, %19 : vector<1x64xf32>
    %21 = vector.broadcast %20 : vector<1x64xf32> to vector<8x64xf32>
    %22 = arith.mulf %10, %21 : vector<8x64xf32>
    %c0_10 = arith.constant 0 : index
    %c0_11 = arith.constant 0 : index
    %23 = vector.load %arg3[%c0_10, %c0_11] : memref<1x64xf32, #tpu.memory_space<vmem>>, vector<1x64xf32>
    %24 = vector.broadcast %23 : vector<1x64xf32> to vector<8x64xf32>
    %25 = arith.addf %22, %24 : vector<8x64xf32>
    %cst_12 = arith.constant 0.000000e+00 : f32
    %26 = vector.broadcast %cst_12 : f32 to vector<8x64xf32>
    %27 = arith.maximumf %25, %26 : vector<8x64xf32>
    %28 = arith.truncf %27 : vector<8x64xf32> to vector<8x64xbf16>
    %c0_13 = arith.constant 0 : index
    %c0_14 = arith.constant 0 : index
    %29 = vector.load %arg4[%c0_13, %c0_14] : memref<64x8xf32, #tpu.memory_space<vmem>>, vector<64x8xf32>
    %30 = arith.truncf %29 : vector<64x8xf32> to vector<64x8xbf16>
    %cst_15 = arith.constant dense<0.000000e+00> : vector<8x8xf32>
    %31 = tpu.matmul %28, %30, %cst_15 {dimension_numbers = #tpu.dot_dimension_numbers<[1], [0], [0], [1], [0, 0, 1, 1], [], []>} : vector<8x64xbf16>, vector<64x8xbf16>, vector<8x8xf32> -> vector<8x8xf32>
    %c0_16 = arith.constant 0 : index
    %c0_17 = arith.constant 0 : index
    %32 = vector.load %arg5[%c0_16, %c0_17] : memref<1x8xf32, #tpu.memory_space<vmem>>, vector<1x8xf32>
    %33 = vector.broadcast %32 : vector<1x8xf32> to vector<8x8xf32>
    %34 = arith.addf %31, %33 : vector<8x8xf32>
    %c0_18 = arith.constant 0 : index
    %c0_19 = arith.constant 0 : index
    %35 = vector.load %arg6[%c0_18, %c0_19] : memref<8x8xf32, #tpu.memory_space<vmem>>, vector<8x8xf32>
    tpu.vector_store %arg6[%c0_18, %c0_19], %34 {strides = array<i32>} : memref<8x8xf32, #tpu.memory_space<vmem>>, vector<8x8xf32>,
    return
  }
}

</mosaic_0001>

<bundles_post_ra>
// kernel: tpu_custom_call.1
= control target key start
LH: loop header
LB: loop body
LE: loop exit
PB: predicated region body
PF: predicated region fallthrough
CT: control target
= control target key end

     0   :  { %v257_v3 = vmov 0.0   ;;  %vm258_vm0 = vmmov 0   ;;  %s358_s0 = inlined_call_operand.vmem [shape: f32[8,32], index: 0, kind: input, shape index: {}]   ;;  %s359_s1 = inlined_call_operand.vmem [shape: f32[32,64], index: 1, kind: input, shape index: {}]   ;;  %s360_s2 = inlined_call_operand.vmem [shape: f32[1,64], index: 2, kind: input, shape index: {}]   ;;  %s361_s3 = inlined_call_operand.vmem [shape: f32[1,64], index: 3, kind: input, shape index: {}]   ;;  %s362_s4 = inlined_call_operand.vmem [shape: f32[64,8], index: 4, kind: input, shape index: {}]   ;;  %s363_s5 = inlined_call_operand.vmem [shape: f32[1,8], index: 5, kind: input, shape index: {}]   ;;  %s364_s6 = inlined_call_operand.hbm [shape: f32[8,8], index: 6, kind: output, shape index: {}]  }
   0x1   :  { %v27_v0 = vld [vmem:[%s359_s1] sm:$0xff]  ;;  %v28_v1 = vld [vmem:[%s359_s1 + $0x8] sm:$0xff]  ;;  %v29_v2 = vld [vmem:[%s359_s1 + $0x10] sm:$0xff]  ;;  %208 = vmatprep.subr.bf16.mxu0 %v257_v3  ;;  %212 = vmatprep.mubr.msk.bf16.mxu0 %vm258_vm0, %v257_v3 }
   0x2   :  { %v31_v4 = vpack.c.bf16 %v28_v1, %v27_v0  ;;  %v30_v5 = vld [vmem:[%s359_s1 + $0x18] sm:$0xff] }
   0x3   :  { %11 = vsyncpa [#allocation3], 0  ;;  %216 = vmatprep.subr.bf16.mxu1 %v257_v3  ;;  %224 = vmatprep.mubr.msk.bf16.mxu1 %vm258_vm0, %v257_v3  ;;  %v32_v6 = vpack.c.bf16 %v30_v5, %v29_v2  ;;  %v25_v7 = vld [vmem:[%s358_s0] sm:$0xff]  ;;  %vm33_vm1 = vcmask 261120   ;;  %v119_v10 = vld [vmem:[%s362_s4 + $0x8] sm:$0xff]  ;;  %vm77_vm2 = vcmask 523264   ;;  %v102_v44 = vlaneseq }
   0x4   :  { %209 = vmatpush3.bf16.msra.mxu0 %v31_v4  ;;  %v26_v8 = vpack.c.bf16 %v25_v7, %v25_v7  ;;  %v118_v9 = vld [vmem:[%s362_s4] sm:$0xff]  ;;  %v120_v12 = vld [vmem:[%s362_s4 + $0x10] sm:$0xff]  ;;  %v121_v13 = vld [vmem:[%s362_s4 + $0x18] sm:$0xff]  ;;  %s259_s26 = smov [#allocation2]   ;;  %vm180_vm3 = vcmask 64512  }
   0x5   :  { %210 = vmatprep.subr.bf16.mxu0 %v257_v3  ;;  %v126_v11 = vpack.c.bf16 %v119_v10, %v118_v9  ;;  %v127_v14 = vpack.c.bf16 %v121_v13, %v120_v12  ;;  %v122_v15 = vld [vmem:[%s362_s4 + $0x20] sm:$0xff]  ;;  %v123_v16 = vld [vmem:[%s362_s4 + $0x28] sm:$0xff]  ;;  %v124_v18 = vld [vmem:[%s362_s4 + $0x30] sm:$0xff]  ;;  %v103_v45 = vshrl.u32 %v102_v44, 7 }
   0x6   :  { %v128_v17 = vpack.c.bf16 %v123_v16, %v122_v15  ;;  %v125_v19 = vld [vmem:[%s362_s4 + $0x38] sm:$0xff]  ;;  %v97_v46 = vld [vmem:[%s360_s2] sm:$0x1]  ;;  %s188_s2 = sshll.u32 %s259_s26, 4  ;;  %s189_s2 = int_to_ptr.vmem [resolvable:$true] %s188_s2 }
   0x7   :  { %217 = vmatpush3.bf16.msra.mxu1 %v126_v11  ;;  %v129_v20 = vpack.c.bf16 %v125_v19, %v124_v18  ;;  %v104_v47 = vsub.s32 0, %v103_v45  ;;  %v197_v51 = vld [vmem:[%s361_s3] ss:$0 sm:$0xff]  ;;  %s233_s3 = scalar_lea.vmem %s189_s2, 128  ;;  %p238_p1 = scmp.lt.s32.totalorder %s189_s2, %s189_s2 }
   0x8   :  { %211 = vmatpush3.bf16.msra.mxu0 %v32_v6  ;;  %218 = vmatprep.subr.bf16.mxu1 %v257_v3  ;;  %v198_v56 = vld [vmem:[%s363_s5] ss:$0 sm:$0xff]  ;;  %p234_p0 = scmp.ne.s32.totalorder %s189_s2, %s233_s3  ;;  %p239_p2 = scmp.lt.s32.totalorder %s233_s3, %s233_s3 }
   0xa   :  { %p240_p3 = por %p239_p2, %p238_p1 }
   0xb   :  { %213 = vmatmul.mubr.msk.bf16.vlgmr.msra.gmra.mrb[0].mxu0 %vm33_vm1, %v26_v8  ;;  %219 = vmatpush3.bf16.msra.mxu1 %v127_v14 }
   0xc   :  { %220 = vmatprep.subr.bf16.mxu1 %v257_v3  ;;  %p241_p4 = pnand %p240_p3, %p234_p0 }
   0xf   :  { %221 = vmatpush3.bf16.msra.mxu1 %v128_v17 }
  0x10   :  { %222 = vmatprep.subr.bf16.mxu1 %v257_v3 }
  0x13   :  { %223 = vmatpush3.bf16.msra.mxu1 %v129_v20 }
  0xde   :  { %v71_v21 = vpop.f32.mrb[0].mxu0 }
  0xdf   :  { %v78_v22 = vsel %vm77_vm2, %v71_v21, 0.0  ;;  %v214_v23 = vpop.f32.mrb[1].mxu0 }
  0xe0   :  { %v79_v24 = vrot.slane %v78_v22, 4  ;;  %v74_v25 = vpop.f32.mrb[2].mxu0 }
  0xe1   :  { %v215_v26 = vpop.f32.mrb[3].mxu0 }
  0xe2   :  { %v80_v27 = vadd.f32 %v79_v24, %v78_v22 }
  0xe4   :  { %v81_v28 = vrot.slane %v80_v27, 2 }
  0xe6   :  { %v82_v29 = vadd.f32 %v81_v28, %v80_v27 }
  0xe8   :  { %v83_v30 = vrot.slane %v82_v29, 1 }
  0xea   :  { %v84_v31 = vadd.f32 %v83_v30, %v82_v29 }
  0xec   :  { %v86_v32 = vmul.f32 0.125, %v84_v31 }
  0xee   :  { %v87_v33 = vsub.f32 %v71_v21, %v86_v32 }
  0xf0   :  { %v88_v34 = vmul.f32 %v87_v33, %v87_v33 }
  0xf2   :  { %v89_v35 = vsel %vm77_vm2, %v88_v34, 0.0 }
  0xf3   :  { %v90_v36 = vrot.slane %v89_v35, 4 }
  0xf5   :  { %v91_v37 = vadd.f32 %v90_v36, %v89_v35 }
  0xf7   :  { %v92_v38 = vrot.slane %v91_v37, 2 }
  0xf9   :  { %v93_v39 = vadd.f32 %v92_v38, %v91_v37 }
  0xfb   :  { %v94_v40 = vrot.slane %v93_v39, 1 }
  0xfd   :  { %v95_v41 = vadd.f32 %v94_v40, %v93_v39 }
  0xff   :  { %v96_v42 = vmul.f32 0.125, %v95_v41 }
 0x101   :  { %v98_v43 = vadd.f32 1e-05, %v96_v42 }
 0x103   :  { %231 = vrsqrt.f32 %v98_v43 }
 0x10d   :  { %v232_v48 = vpop.eup %231 }
 0x10e   :  { %v100_v49 = vmul.f32 %v232_v48, %v97_v46 }
 0x110   :  { %v105_v50 = vrot.slane %v100_v49, %v104_v47 }
 0x112   :  { %v107_v52 = vmul.f32 %v105_v50, %v87_v33 }
 0x114   :  { %v115_v53 = vadd.f32 %v197_v51, %v107_v52 }
 0x116   :  { %v116_v54 = vmax.f32 %v115_v53, 0.0 }
 0x118   :  { %v117_v55 = vpack.c.bf16 %v116_v54, %v116_v54 }
 0x11a   :  { %225 = vmatmul.mubr.msk.bf16.vlgmr.msra.gmra.mrb[0].mxu1 %vm77_vm2, %v117_v55 }
 0x1ed   :  { %v174_v57 = vpop.f32.mrb[0].mxu1 }
 0x1ee   :  { %v175_v58 = vadd.f32 %v198_v56, %v174_v57  ;;  %v226_v59 = vpop.f32.mrb[1].mxu1 }
 0x1ef   :  { %v177_v60 = vpop.f32.mrb[2].mxu1 }
 0x1f0   :  { %v227_v61 = vpop.f32.mrb[3].mxu1  ;;  %181 = vst.msk [vmem:[#allocation2] sm:$0xff] %vm180_vm3, %v175_v58 }
 0x1f1   :  { %244 = shalt.err (!%p241_p4)
}
 0x1f2   :  { %s245_s5 = scalar_lea.hbm %s364_s6, 128 }
 0x1f3   :  { %p246_p5 = scmp.ne.s32.totalorder %s364_s6, %s245_s5  ;;  %p249_p6 = scmp.lt.u32.totalorder %s245_s5, %s364_s6 }
 0x1f5   :  { %p251_p7 = pnand %p249_p6, %p246_p5 }
 0x1f7   :  { %254 = shalt.err (!%p251_p7)
}
 0x1f8   :  { %191 = dma.vmem_to_hbm [thread:$0]  %s189_s2, 128, %s364_s6, [#allocation3]  }
 0x1f9   :  { %255 = dma.done.wait [#allocation3], 128  }
 0x1fa   :  { %256 = vsyncadd [#allocation3], 4294967168 }
 0x1fb   :  { %195 = vsyncpa [#allocation3], 1 }

</bundles_post_ra>
